<compile_context>
chip_gen: v6e
topology: v6e:2x2x1
jax: 0.10.0
libtpu: 0.0.40
codegen_flags: <defaults>
</compile_context>

<pallas_src>
import functools

import jax
import jax.numpy as jnp
from jax.experimental import pallas as pl
from jax.experimental.pallas import tpu as pltpu


# ---------------------------------------------------------------------------
# VMEM sizing helpers
# ---------------------------------------------------------------------------
def _round_up(x, m):
    return ((x + m - 1) // m) * m


def _tile_bytes(rows, sub, lane, itemsize):
    """Rough VMEM footprint of a (rows, sub, lane) tile (sublane/lane padded)."""
    return rows * _round_up(max(sub, 1), 8) * _round_up(max(lane, 1), 128) * itemsize


def _vmem_capacity_bytes():
    """Per-core VMEM capacity; conservative fallback if the query is unavailable."""
    try:
        info = pltpu.get_tpu_info()
        cap = getattr(info, "vmem_capacity_bytes", None)
        if cap:
            return int(cap)
    except Exception:
        pass
    return 64 * 1024 * 1024          # v7x per-TensorCore VMEM (smallest of the three gens)


def _vmem_estimate(b_blk, h_blk, *, N, C, H, hd, in_isz, cmp_isz, out_isz):
    """Estimate of all VMEM consumers for one pipelined grid step."""
    HB = H // h_blk
    x_tiles   = 2 * 2 * _tile_bytes(b_blk, N, C, in_isz)            # q-side + k-side x, 2x buffered
    weight    = 2 * _tile_bytes(1, C, 2 * C, in_isz)                # (C, 2C) slab (conservative: 2 bufs)
    out_tile  = 2 * _tile_bytes(b_blk * h_blk, N, N, out_isz)       # 2x buffered output block
    scratch   = 2 * _tile_bytes(HB * b_blk * h_blk, N, hd, cmp_isz) # q/k projection scratch
    proj_tmp  = 2 * _tile_bytes(1, b_blk * N, C, 4)                 # f32 projection results (hb == 0)
    score_tmp = 3 * _tile_bytes(b_blk * h_blk, N, N, 4)             # f32 scores / exp / softmax temps
    return x_tiles + weight + out_tile + scratch + proj_tmp + score_tmp


def _pick_blocks(B, H, *, N, C, hd, in_isz, cmp_isz, out_isz, budget):
    """Largest (batch-block, head-block) divisors of (B, H) fitting the VMEM budget."""
    b_divs = [d for d in range(B, 0, -1) if B % d == 0]
    h_divs = [d for d in range(H, 0, -1) if H % d == 0]
    for b_blk in b_divs:
        for h_blk in h_divs:
            if _vmem_estimate(b_blk, h_blk, N=N, C=C, H=H, hd=hd, in_isz=in_isz,
                              cmp_isz=cmp_isz, out_isz=out_isz) <= budget:
                return b_blk, h_blk
    return 1, 1


# ---------------------------------------------------------------------------
# Fused kernel: per (t, batch-block, head-block)
#   hb == 0 : project q, project temporally shifted k, stash head-major in VMEM
#   every hb: scaled scores + softmax for h_blk heads, one lane-dense store
# ---------------------------------------------------------------------------
def _attn_kernel(xq_ref, xk_ref, w_ref, o_ref, q_scr, k_scr, *,
                 num_heads, head_dim, h_block):
    b_blk, _, N, C = xq_ref.shape
    H, hd = num_heads, head_dim
    hb = pl.program_id(2)

    # --- q/k projection: once per (t, batch-block), reused across the head axis ---
    @pl.when(hb == 0)
    def _():
        xq = xq_ref[:, 0].reshape(b_blk * N, C)
        xk = xk_ref[:, 0].reshape(b_blk * N, C)          # time-shifted tile (index_map)
        # scale already folded into the Wq columns in the wrapper.
        q = jnp.dot(xq, w_ref[:, :C], preferred_element_type=jnp.float32)
        k = jnp.dot(xk, w_ref[:, C:], preferred_element_type=jnp.float32)
        qc = q.astype(q_scr.dtype)
        kc = k.astype(k_scr.dtype)
        # One-time head-major re-layout so per-step reads are aligned leading-dim loads.
        for h in range(H):
            blk, off = h // h_block, h % h_block
            q_scr[blk, :, off] = qc[:, h * hd:(h + 1) * hd].reshape(b_blk, N, hd)
            k_scr[blk, :, off] = kc[:, h * hd:(h + 1) * hd].reshape(b_blk, N, hd)

    # --- scores + softmax for this head block (single batched contraction) ---
    qh = q_scr[hb].reshape(b_blk * h_block, N, hd)
    kh = k_scr[hb].reshape(b_blk * h_block, N, hd)
    s = jnp.einsum("znd,zmd->znm", qh, kh, preferred_element_type=jnp.float32)
    m = jnp.max(s, axis=-1, keepdims=True)
    p = jnp.exp(s - m)
    denom = jnp.sum(p, axis=-1, keepdims=True)
    attn = p * pl.reciprocal(denom, approx=True)          # EUP slot; ~1e-3 rel row-sum error
    o_ref[0] = attn.reshape(b_blk, h_block, N, N).astype(o_ref.dtype)


# ---------------------------------------------------------------------------
# Wrapper
# ---------------------------------------------------------------------------
def my_attention_pallas(x, w_qkv, *, num_heads, step=1, mxu_dtype="auto",
                        out_dtype=None, b_block=None, h_block=None):
    """x: (B, T, N, C); w_qkv: (3C, C) = nn.Linear(dim, 3*dim, bias=False).weight.

    Returns softmax attention weights of shape (T, B, num_heads, N, N), matching
    the PyTorch module's non-fused forward path (eval-mode dropout).
      mxu_dtype : "auto" (default) -> bf16 MXU operands for f32 inputs
                  (f32 accumulation + f32 softmax); pass jnp.float32 for exact.
      out_dtype : default = x.dtype; pass jnp.bfloat16 to halve output HBM writes.
    """
    B, T, N, C = x.shape
    H = num_heads
    assert C % H == 0, "dim should be divisible by num_heads"
    assert step >= 1, "step must be >= 1 (matches the PyTorch temporal shift)"
    hd = C // H
    scale = hd ** (-0.5)

    # V never reaches the returned tensor on this path: keep only Wq, Wk.
    # Fold the softmax scale into Wq once (constant O(C^2) op in the wrapper).
    w_q = w_qkv[:C].astype(jnp.float32) * scale
    w_k = w_qkv[C:2 * C].astype(jnp.float32)
    w_qk = jnp.transpose(jnp.concatenate([w_q, w_k], axis=0))   # (C, 2C) = [Wq^T*scale | Wk^T]

    if isinstance(mxu_dtype, str) and mxu_dtype == "auto":
        mxu_dtype = jnp.bfloat16 if x.dtype == jnp.float32 else x.dtype
    elif mxu_dtype is None:
        mxu_dtype = x.dtype
    out_dtype = x.dtype if out_dtype is None else out_dtype

    x_in = x.astype(mxu_dtype)
    w_in = w_qk.astype(mxu_dtype)

    in_isz = jnp.dtype(mxu_dtype).itemsize
    out_isz = jnp.dtype(out_dtype).itemsize
    vmem_cap = _vmem_capacity_bytes()
    budget = int(vmem_cap * 0.55)                       # leave slack for compiler internals
    auto_b, auto_h = _pick_blocks(B, H, N=N, C=C, hd=hd, in_isz=in_isz,
                                  cmp_isz=in_isz, out_isz=out_isz, budget=budget)
    b_block = auto_b if b_block is None else b_block
    h_block = auto_h if h_block is None else h_block
    assert B % b_block == 0 and H % h_block == 0, (b_block, h_block)
    HB = H // h_block

    grid = (T, B // b_block, HB)                        # head axis innermost (scratch reuse)
    kernel = functools.partial(_attn_kernel, num_heads=H, head_dim=hd, h_block=h_block)

    out = pl.pallas_call(
        kernel,
        out_shape=jax.ShapeDtypeStruct((T, B, H, N, N), out_dtype),
        grid=grid,
        in_specs=[
            # q-side x tile at (batch block b, time t); stays resident across the head axis.
            pl.BlockSpec((b_block, 1, N, C), lambda t, b, hb: (b, t, 0, 0)),
            # k-side x tile: temporal shift k[t] = x[t] if t < step else x[t-step],
            # expressed purely in the index_map (no shifted HBM copy).
            pl.BlockSpec((b_block, 1, N, C),
                         lambda t, b, hb: (b, jnp.where(t < step, t, t - step), 0, 0)),
            # Fused [Wq^T*scale | Wk^T] slab, constant index -> fetched once.
            pl.BlockSpec((C, 2 * C), lambda t, b, hb: (0, 0)),
        ],
        out_specs=pl.BlockSpec((1, b_block, h_block, N, N),
                               lambda t, b, hb: (t, b, hb, 0, 0)),
        scratch_shapes=[
            pltpu.VMEM((HB, b_block, h_block, N, hd), mxu_dtype),   # projected q (head-major)
            pltpu.VMEM((HB, b_block, h_block, N, hd), mxu_dtype),   # projected, shifted k
        ],
        compiler_params=pltpu.CompilerParams(
            dimension_semantics=("parallel", "parallel", "arbitrary"),
            vmem_limit_bytes=int(vmem_cap * 0.9)),
    )(x_in, x_in, w_in)

    return out   # already (T, B, H, N, N)


# ---------------------------------------------------------------------------
# Pure-JAX reference (mirrors the PyTorch forward, non-fused path)
# ---------------------------------------------------------------------------
def my_attention_ref(x, w_qkv, *, num_heads, step=1):
    B, T, N, C = x.shape
    H = num_heads
    hd = C // H
    scale = hd ** (-0.5)
    qkv = x.reshape(B * T * N, C) @ w_qkv.T
    qkv = qkv.reshape(B, T, N, 3, H, hd)
    qkv = jnp.transpose(qkv, (3, 1, 0, 4, 2, 5))
    q, k = qkv[0], qkv[1]
    k = jnp.concatenate((k[:step], k), axis=0)[:-step]
    attn = jnp.einsum("tbhnd,tbhmd->tbhnm", q * scale, k)
    return jax.nn.softmax(attn, axis=-1)


if __name__ == "__main__":
    # Small shapes consistent with the module: dim divisible by num_heads.
    B, T, N, C = 2, 4, 8, 32
    num_heads = 4          # head_dim = 8
    step = 1

    key = jax.random.PRNGKey(0)
    kx, kw = jax.random.split(key)
    x = jax.random.normal(kx, (B, T, N, C), dtype=jnp.float32)
    # nn.Linear(dim, 3*dim, bias=False) weight: (3*dim, dim)
    w_qkv = jax.random.normal(kw, (3 * C, C), dtype=jnp.float32) * (C ** -0.5)

    ref = my_attention_ref(x, w_qkv, num_heads=num_heads, step=step)

    # 1) Default path: bf16 MXU operands (f32 accumulation / f32 softmax), auto tiling.
    out = my_attention_pallas(x, w_qkv, num_heads=num_heads, step=step)
    out = jax.block_until_ready(out)
    assert out.shape == (T, B, num_heads, N, N), out.shape
    err = float(jnp.max(jnp.abs(out.astype(jnp.float32) - ref)))
    assert err < 8e-2, err

    # 2) f32-operand path with explicit batch/head tiling: exercises the
    #    scratch-reuse 'arbitrary' head axis and the multi-block batch grid.
    out32 = my_attention_pallas(x, w_qkv, num_heads=num_heads, step=step,
                                mxu_dtype=jnp.float32, b_block=1, h_block=2)
    out32 = jax.block_until_ready(out32)
    err32 = float(jnp.max(jnp.abs(out32 - ref)))
    assert err32 < 5e-3, err32

    # 3) Larger temporal shift (validates the index_map shift arithmetic).
    ref2 = my_attention_ref(x, w_qkv, num_heads=num_heads, step=2)
    out2 = my_attention_pallas(x, w_qkv, num_heads=num_heads, step=2,
                               mxu_dtype=jnp.float32)
    out2 = jax.block_until_ready(out2)
    err2 = float(jnp.max(jnp.abs(out2 - ref2)))
    assert err2 < 5e-3, err2

    print("KERNEL_OK")
</pallas_src>

<mosaic_0001>
module attributes {stable_mosaic.version = 11 : i64} {
  func.func @_attn_kernel(%arg0: i32, %arg1: i32, %arg2: i32, %arg3: memref<2x1x8x32xbf16, #tpu.memory_space<vmem>>, %arg4: memref<2x1x8x32xbf16, #tpu.memory_space<vmem>>, %arg5: memref<32x64xbf16, #tpu.memory_space<vmem>>, %arg6: memref<1x2x4x8x8xf32, #tpu.memory_space<vmem>>, %arg7: memref<1x2x4x8x8xbf16, #tpu.memory_space<vmem>>, %arg8: memref<1x2x4x8x8xbf16, #tpu.memory_space<vmem>>) attributes {dimension_semantics = [#tpu.dimension_semantics<parallel>, #tpu.dimension_semantics<parallel>, #tpu.dimension_semantics<arbitrary>], iteration_bounds = array<i64: 4, 1, 1>, scalar_prefetch = 0 : i64, scratch_operands = 2 : i64, tpu.core_type = #tpu.core_type<tc>, window_params = [{transform_indices = @transform_0, window_bounds = array<i64: 2, 1, 8, 32>}, {transform_indices = @transform_1, window_bounds = array<i64: 2, 1, 8, 32>}, {pipeline_mode = #tpu.pipeline_mode<synchronous>, transform_indices = @transform_2, window_bounds = array<i64: 32, 64>}, {transform_indices = @transform_3, window_bounds = array<i64: 1, 2, 4, 8, 8>}]} {
    %c0_i32 = arith.constant 0 : i32
    %0 = arith.cmpi eq, %arg2, %c0_i32 : i32
    %1 = arith.extui %0 : i1 to i32
    %c0_i32_0 = arith.constant 0 : i32
    %2 = arith.cmpi ne, %1, %c0_i32_0 : i32
    scf.if %2 {
      %c0_15 = arith.constant 0 : index
      %c0_16 = arith.constant 0 : index
      %c0_17 = arith.constant 0 : index
      %c0_18 = arith.constant 0 : index
      %26 = vector.load %arg3[%c0_15, %c0_16, %c0_17, %c0_18] : memref<2x1x8x32xbf16, #tpu.memory_space<vmem>>, vector<2x1x8x32xbf16>
      %27 = vector.shape_cast %26 : vector<2x1x8x32xbf16> to vector<2x8x32xbf16>
      %28 = vector.shape_cast %27 : vector<2x8x32xbf16> to vector<16x32xbf16>
      %c0_19 = arith.constant 0 : index
      %c0_20 = arith.constant 0 : index
      %c0_21 = arith.constant 0 : index
      %c0_22 = arith.constant 0 : index
      %29 = vector.load %arg4[%c0_19, %c0_20, %c0_21, %c0_22] : memref<2x1x8x32xbf16, #tpu.memory_space<vmem>>, vector<2x1x8x32xbf16>
      %30 = vector.shape_cast %29 : vector<2x1x8x32xbf16> to vector<2x8x32xbf16>
      %31 = vector.shape_cast %30 : vector<2x8x32xbf16> to vector<16x32xbf16>
      %c0_23 = arith.constant 0 : index
      %c0_24 = arith.constant 0 : index
      %32 = vector.load %arg5[%c0_23, %c0_24] : memref<32x64xbf16, #tpu.memory_space<vmem>>, vector<32x32xbf16>
      %cst_25 = arith.constant dense<0.000000e+00> : vector<16x32xf32>
      %33 = tpu.matmul %28, %32, %cst_25 {dimension_numbers = #tpu.dot_dimension_numbers<[1], [0], [0], [1], [0, 0, 1, 1], [], []>} : vector<16x32xbf16>, vector<32x32xbf16>, vector<16x32xf32> -> vector<16x32xf32>
      %c0_26 = arith.constant 0 : index
      %c32 = arith.constant 32 : index
      %34 = vector.load %arg5[%c0_26, %c32] : memref<32x64xbf16, #tpu.memory_space<vmem>>, vector<32x32xbf16>
      %cst_27 = arith.constant dense<0.000000e+00> : vector<16x32xf32>
      %35 = tpu.matmul %31, %34, %cst_27 {dimension_numbers = #tpu.dot_dimension_numbers<[1], [0], [0], [1], [0, 0, 1, 1], [], []>} : vector<16x32xbf16>, vector<32x32xbf16>, vector<16x32xf32> -> vector<16x32xf32>
      %36 = arith.truncf %33 : vector<16x32xf32> to vector<16x32xbf16>
      %37 = arith.truncf %35 : vector<16x32xf32> to vector<16x32xbf16>
      %38 = vector.extract_strided_slice %36 {offsets = [0, 0], sizes = [16, 8], strides = [1, 1]} : vector<16x32xbf16> to vector<16x8xbf16>
      %39 = vector.shape_cast %38 : vector<16x8xbf16> to vector<2x8x8xbf16>
      %c0_28 = arith.constant 0 : index
      %c0_29 = arith.constant 0 : index
      %c0_30 = arith.constant 0 : index
      %c0_31 = arith.constant 0 : index
      %c0_32 = arith.constant 0 : index
      %40 = vector.load %arg7[%c0_28, %c0_29, %c0_30, %c0_31, %c0_32] : memref<1x2x4x8x8xbf16, #tpu.memory_space<vmem>>, vector<1x2x1x8x8xbf16>
      %41 = vector.shape_cast %40 : vector<1x2x1x8x8xbf16> to vector<2x8x8xbf16>
      %42 = vector.shape_cast %39 : vector<2x8x8xbf16> to vector<1x2x1x8x8xbf16>
      tpu.vector_store %arg7[%c0_28, %c0_29, %c0_30, %c0_31, %c0_32], %42 {strides = array<i32>} : memref<1x2x4x8x8xbf16, #tpu.memory_space<vmem>>, vector<1x2x1x8x8xbf16>,
      %43 = vector.extract_strided_slice %37 {offsets = [0, 0], sizes = [16, 8], strides = [1, 1]} : vector<16x32xbf16> to vector<16x8xbf16>
      %44 = vector.shape_cast %43 : vector<16x8xbf16> to vector<2x8x8xbf16>
      %c0_33 = arith.constant 0 : index
      %c0_34 = arith.constant 0 : index
      %c0_35 = arith.constant 0 : index
      %c0_36 = arith.constant 0 : index
      %c0_37 = arith.constant 0 : index
      %45 = vector.load %arg8[%c0_33, %c0_34, %c0_35, %c0_36, %c0_37] : memref<1x2x4x8x8xbf16, #tpu.memory_space<vmem>>, vector<1x2x1x8x8xbf16>
      %46 = vector.shape_cast %45 : vector<1x2x1x8x8xbf16> to vector<2x8x8xbf16>
      %47 = vector.shape_cast %44 : vector<2x8x8xbf16> to vector<1x2x1x8x8xbf16>
      tpu.vector_store %arg8[%c0_33, %c0_34, %c0_35, %c0_36, %c0_37], %47 {strides = array<i32>} : memref<1x2x4x8x8xbf16, #tpu.memory_space<vmem>>, vector<1x2x1x8x8xbf16>,
      %48 = vector.extract_strided_slice %36 {offsets = [0, 8], sizes = [16, 8], strides = [1, 1]} : vector<16x32xbf16> to vector<16x8xbf16>
      %49 = vector.shape_cast %48 : vector<16x8xbf16> to vector<2x8x8xbf16>
      %c0_38 = arith.constant 0 : index
      %c0_39 = arith.constant 0 : index
      %c1 = arith.constant 1 : index
      %c0_40 = arith.constant 0 : index
      %c0_41 = arith.constant 0 : index
      %50 = vector.load %arg7[%c0_38, %c0_39, %c1, %c0_40, %c0_41] : memref<1x2x4x8x8xbf16, #tpu.memory_space<vmem>>, vector<1x2x1x8x8xbf16>
      %51 = vector.shape_cast %50 : vector<1x2x1x8x8xbf16> to vector<2x8x8xbf16>
      %52 = vector.shape_cast %49 : vector<2x8x8xbf16> to vector<1x2x1x8x8xbf16>
      tpu.vector_store %arg7[%c0_38, %c0_39, %c1, %c0_40, %c0_41], %52 {strides = array<i32>} : memref<1x2x4x8x8xbf16, #tpu.memory_space<vmem>>, vector<1x2x1x8x8xbf16>,
      %53 = vector.extract_strided_slice %37 {offsets = [0, 8], sizes = [16, 8], strides = [1, 1]} : vector<16x32xbf16> to vector<16x8xbf16>
      %54 = vector.shape_cast %53 : vector<16x8xbf16> to vector<2x8x8xbf16>
      %c0_42 = arith.constant 0 : index
      %c0_43 = arith.constant 0 : index
      %c1_44 = arith.constant 1 : index
      %c0_45 = arith.constant 0 : index
      %c0_46 = arith.constant 0 : index
      %55 = vector.load %arg8[%c0_42, %c0_43, %c1_44, %c0_45, %c0_46] : memref<1x2x4x8x8xbf16, #tpu.memory_space<vmem>>, vector<1x2x1x8x8xbf16>
      %56 = vector.shape_cast %55 : vector<1x2x1x8x8xbf16> to vector<2x8x8xbf16>
      %57 = vector.shape_cast %54 : vector<2x8x8xbf16> to vector<1x2x1x8x8xbf16>
      tpu.vector_store %arg8[%c0_42, %c0_43, %c1_44, %c0_45, %c0_46], %57 {strides = array<i32>} : memref<1x2x4x8x8xbf16, #tpu.memory_space<vmem>>, vector<1x2x1x8x8xbf16>,
      %58 = vector.extract_strided_slice %36 {offsets = [0, 16], sizes = [16, 8], strides = [1, 1]} : vector<16x32xbf16> to vector<16x8xbf16>
      %59 = vector.shape_cast %58 : vector<16x8xbf16> to vector<2x8x8xbf16>
      %c0_47 = arith.constant 0 : index
      %c0_48 = arith.constant 0 : index
      %c2 = arith.constant 2 : index
      %c0_49 = arith.constant 0 : index
      %c0_50 = arith.constant 0 : index
      %60 = vector.load %arg7[%c0_47, %c0_48, %c2, %c0_49, %c0_50] : memref<1x2x4x8x8xbf16, #tpu.memory_space<vmem>>, vector<1x2x1x8x8xbf16>
      %61 = vector.shape_cast %60 : vector<1x2x1x8x8xbf16> to vector<2x8x8xbf16>
      %62 = vector.shape_cast %59 : vector<2x8x8xbf16> to vector<1x2x1x8x8xbf16>
      tpu.vector_store %arg7[%c0_47, %c0_48, %c2, %c0_49, %c0_50], %62 {strides = array<i32>} : memref<1x2x4x8x8xbf16, #tpu.memory_space<vmem>>, vector<1x2x1x8x8xbf16>,
      %63 = vector.extract_strided_slice %37 {offsets = [0, 16], sizes = [16, 8], strides = [1, 1]} : vector<16x32xbf16> to vector<16x8xbf16>
      %64 = vector.shape_cast %63 : vector<16x8xbf16> to vector<2x8x8xbf16>
      %c0_51 = arith.constant 0 : index
      %c0_52 = arith.constant 0 : index
      %c2_53 = arith.constant 2 : index
      %c0_54 = arith.constant 0 : index
      %c0_55 = arith.constant 0 : index
      %65 = vector.load %arg8[%c0_51, %c0_52, %c2_53, %c0_54, %c0_55] : memref<1x2x4x8x8xbf16, #tpu.memory_space<vmem>>, vector<1x2x1x8x8xbf16>
      %66 = vector.shape_cast %65 : vector<1x2x1x8x8xbf16> to vector<2x8x8xbf16>
      %67 = vector.shape_cast %64 : vector<2x8x8xbf16> to vector<1x2x1x8x8xbf16>
      tpu.vector_store %arg8[%c0_51, %c0_52, %c2_53, %c0_54, %c0_55], %67 {strides = array<i32>} : memref<1x2x4x8x8xbf16, #tpu.memory_space<vmem>>, vector<1x2x1x8x8xbf16>,
      %68 = vector.extract_strided_slice %36 {offsets = [0, 24], sizes = [16, 8], strides = [1, 1]} : vector<16x32xbf16> to vector<16x8xbf16>
      %69 = vector.shape_cast %68 : vector<16x8xbf16> to vector<2x8x8xbf16>
      %c0_56 = arith.constant 0 : index
      %c0_57 = arith.constant 0 : index
      %c3 = arith.constant 3 : index
      %c0_58 = arith.constant 0 : index
      %c0_59 = arith.constant 0 : index
      %70 = vector.load %arg7[%c0_56, %c0_57, %c3, %c0_58, %c0_59] : memref<1x2x4x8x8xbf16, #tpu.memory_space<vmem>>, vector<1x2x1x8x8xbf16>
      %71 = vector.shape_cast %70 : vector<1x2x1x8x8xbf16> to vector<2x8x8xbf16>
      %72 = vector.shape_cast %69 : vector<2x8x8xbf16> to vector<1x2x1x8x8xbf16>
      tpu.vector_store %arg7[%c0_56, %c0_57, %c3, %c0_58, %c0_59], %72 {strides = array<i32>} : memref<1x2x4x8x8xbf16, #tpu.memory_space<vmem>>, vector<1x2x1x8x8xbf16>,
      %73 = vector.extract_strided_slice %37 {offsets = [0, 24], sizes = [16, 8], strides = [1, 1]} : vector<16x32xbf16> to vector<16x8xbf16>
      %74 = vector.shape_cast %73 : vector<16x8xbf16> to vector<2x8x8xbf16>
      %c0_60 = arith.constant 0 : index
      %c0_61 = arith.constant 0 : index
      %c3_62 = arith.constant 3 : index
      %c0_63 = arith.constant 0 : index
      %c0_64 = arith.constant 0 : index
      %75 = vector.load %arg8[%c0_60, %c0_61, %c3_62, %c0_63, %c0_64] : memref<1x2x4x8x8xbf16, #tpu.memory_space<vmem>>, vector<1x2x1x8x8xbf16>
      %76 = vector.shape_cast %75 : vector<1x2x1x8x8xbf16> to vector<2x8x8xbf16>
      %77 = vector.shape_cast %74 : vector<2x8x8xbf16> to vector<1x2x1x8x8xbf16>
      tpu.vector_store %arg8[%c0_60, %c0_61, %c3_62, %c0_63, %c0_64], %77 {strides = array<i32>} : memref<1x2x4x8x8xbf16, #tpu.memory_space<vmem>>, vector<1x2x1x8x8xbf16>,
    } else {
    }
    %3 = arith.index_cast %arg2 : i32 to index
    %c0 = arith.constant 0 : index
    %c0_1 = arith.constant 0 : index
    %c0_2 = arith.constant 0 : index
    %c0_3 = arith.constant 0 : index
    %4 = vector.load %arg7[%3, %c0, %c0_1, %c0_2, %c0_3] : memref<1x2x4x8x8xbf16, #tpu.memory_space<vmem>>, vector<1x2x4x8x8xbf16>
    %5 = vector.shape_cast %4 : vector<1x2x4x8x8xbf16> to vector<2x4x8x8xbf16>
    %6 = vector.shape_cast %5 : vector<2x4x8x8xbf16> to vector<8x8x8xbf16>
    %7 = arith.index_cast %arg2 : i32 to index
    %c0_4 = arith.constant 0 : index
    %c0_5 = arith.constant 0 : index
    %c0_6 = arith.constant 0 : index
    %c0_7 = arith.constant 0 : index
    %8 = vector.load %arg8[%7, %c0_4, %c0_5, %c0_6, %c0_7] : memref<1x2x4x8x8xbf16, #tpu.memory_space<vmem>>, vector<1x2x4x8x8xbf16>
    %9 = vector.shape_cast %8 : vector<1x2x4x8x8xbf16> to vector<2x4x8x8xbf16>
    %10 = vector.shape_cast %9 : vector<2x4x8x8xbf16> to vector<8x8x8xbf16>
    "tpu.trace_start"() <{level = 10 : i32, message = "znd,zmd->znm"}> : () -> ()
    %cst = arith.constant dense<0.000000e+00> : vector<8x8x8xf32>
    %11 = tpu.matmul %6, %10, %cst {dimension_numbers = #tpu.dot_dimension_numbers<[2], [2], [1], [1], [0, 0, 0, 1, 1, 1], [0], [0]>} : vector<8x8x8xbf16>, vector<8x8x8xbf16>, vector<8x8x8xf32> -> vector<8x8x8xf32>
    "tpu.trace_stop"() : () -> ()
    %cst_8 = arith.constant dense<0xFF800000> : vector<8x8xf32>
    %12 = vector.multi_reduction <maximumf>, %11, %cst_8 [2] : vector<8x8x8xf32> to vector<8x8xf32>
    %13 = vector.shape_cast %12 : vector<8x8xf32> to vector<8x8x1xf32>
    %14 = vector.broadcast %13 : vector<8x8x1xf32> to vector<8x8x8xf32>
    %15 = arith.subf %11, %14 : vector<8x8x8xf32>
    %16 = math.exp %15 : vector<8x8x8xf32>
    %cst_9 = arith.constant dense<0.000000e+00> : vector<8x8xf32>
    %17 = vector.multi_reduction <add>, %16, %cst_9 [2] : vector<8x8x8xf32> to vector<8x8xf32>
    %18 = vector.shape_cast %17 : vector<8x8xf32> to vector<8x8x1xf32>
    %19 = tpu.reciprocal %18 {approx = true} : vector<8x8x1xf32> -> vector<8x8x1xf32>
    %20 = vector.broadcast %19 : vector<8x8x1xf32> to vector<8x8x8xf32>
    %21 = arith.mulf %16, %20 : vector<8x8x8xf32>
    %22 = vector.shape_cast %21 : vector<8x8x8xf32> to vector<2x4x8x8xf32>
    %c0_10 = arith.constant 0 : index
    %c0_11 = arith.constant 0 : index
    %c0_12 = arith.constant 0 : index
    %c0_13 = arith.constant 0 : index
    %c0_14 = arith.constant 0 : index
    %23 = vector.load %arg6[%c0_10, %c0_11, %c0_12, %c0_13, %c0_14] : memref<1x2x4x8x8xf32, #tpu.memory_space<vmem>>, vector<1x2x4x8x8xf32>
    %24 = vector.shape_cast %23 : vector<1x2x4x8x8xf32> to vector<2x4x8x8xf32>
    %25 = vector.shape_cast %22 : vector<2x4x8x8xf32> to vector<1x2x4x8x8xf32>
    tpu.vector_store %arg6[%c0_10, %c0_11, %c0_12, %c0_13, %c0_14], %25 {strides = array<i32>} : memref<1x2x4x8x8xf32, #tpu.memory_space<vmem>>, vector<1x2x4x8x8xf32>,
    return
  }
  func.func @transform_0(%arg0: i32, %arg1: i32, %arg2: i32) -> (i32, i32, i32, i32) {
    %c0_i32 = arith.constant 0 : i32
    %c0_i32_0 = arith.constant 0 : i32
    %c0_i32_1 = arith.constant 0 : i32
    return %arg1, %arg0, %c0_i32, %c0_i32_0 : i32, i32, i32, i32
  }
  func.func @transform_1(%arg0: i32, %arg1: i32, %arg2: i32) -> (i32, i32, i32, i32) {
    %c1_i32 = arith.constant 1 : i32
    %0 = arith.cmpi slt, %arg0, %c1_i32 : i32
    %c1_i32_0 = arith.constant 1 : i32
    %1 = arith.subi %arg0, %c1_i32_0 : i32
    %2 = arith.select %0, %arg0, %1 : i32
    %c0_i32 = arith.constant 0 : i32
    %c0_i32_1 = arith.constant 0 : i32
    %c0_i32_2 = arith.constant 0 : i32
    return %arg1, %2, %c0_i32, %c0_i32_1 : i32, i32, i32, i32
  }
  func.func @transform_2(%arg0: i32, %arg1: i32, %arg2: i32) -> (i32, i32) {
    %c0_i32 = arith.constant 0 : i32
    %c0_i32_0 = arith.constant 0 : i32
    %c0_i32_1 = arith.constant 0 : i32
    return %c0_i32, %c0_i32_0 : i32, i32
  }
  func.func @transform_3(%arg0: i32, %arg1: i32, %arg2: i32) -> (i32, i32, i32, i32, i32) {
    %c0_i32 = arith.constant 0 : i32
    %c0_i32_0 = arith.constant 0 : i32
    %c0_i32_1 = arith.constant 0 : i32
    return %arg0, %arg1, %arg2, %c0_i32, %c0_i32_0 : i32, i32, i32, i32, i32
  }
}

</mosaic_0001>

<bundles_post_ra>
// kernel: tpu_custom_call.1
= control target key start
LH: loop header
LB: loop body
LE: loop exit
PB: predicated region body
PF: predicated region fallthrough
CT: control target
= control target key end

     0   :  { %s2000_s0 = inlined_call_operand.hbm [shape: bf16[2,4,8,32], index: 0, kind: input, shape index: {}]   ;;  %s2001_s1 = inlined_call_operand.hbm [shape: bf16[2,4,8,32], index: 1, kind: input, shape index: {}]   ;;  %s2002_s2 = inlined_call_operand.hbm [shape: bf16[32,64], index: 2, kind: input, shape index: {}]   ;;  %s2003_s3 = inlined_call_operand.hbm [shape: f32[4,2,4,8,8], index: 3, kind: output, shape index: {}]  }
   0x1   :  { %2023 = sst [smem:[#allocation23_spill]] %s2000_s0 }
   0x2   :  { %2024 = sst [smem:[#allocation24_spill]] %s2002_s2 }
   0x3   :  { %2025 = sst [smem:[#allocation25_spill]] %s2003_s3 }
   0x4   :  { %8 = vsyncpa [#allocation5], 0 }
   0x5   :  { %10 = vsyncpa [#allocation5 + $0x1], 0 }
   0x6   :  { %11 = vsyncpa [#allocation8], 0 }
   0x7   :  { %13 = vsyncpa [#allocation8 + $0x1], 0 }
   0x8   :  { %14 = vsyncpa [#allocation6], 0 }
   0x9   :  { %16 = vsyncpa [#allocation6 + $0x1], 0  ;;  %s1640_s12 = smov 0   ;;  %s1642_s13 = smov 0  }
   0xa   :  { %s1644_s14 = smov 0   ;;  %s1646_s15 = smov 0  }
   0xb   :  { %s1648_s16 = smov 0   ;;  %s1650_s17 = smov 0  }
   0xc   :  { %s1652_s18 = smov 0   ;;  %s1654_s19 = smov 0  }
   0xd   :  { %s1656_s20 = smov 0  }
   0xe LB: > { %2026 = sst [smem:[#allocation15_spill]] %s1575_s13  ;;  %s1684_s21 = sadd.s32 4294967295, %s1603_s20   ;;  %s1603_s20 = sphi %s1656_s20, %s22_s20   ;;  %s1599_s19 = sphi %s1654_s19, %s2072_s19   ;;  %s1595_s18 = sphi %s1652_s18, %s2071_s18   ;;  %s1591_s17 = sphi %s1650_s17, %s2066_s17   ;;  %s1587_s16 = sphi %s1648_s16, %s2070_s16   ;;  %s1583_s15 = sphi %s1646_s15, %s2069_s15   ;;  %s1579_s14 = sphi %s1644_s14, %s2068_s14   ;;  %s1575_s13 = sphi %s1642_s13, %s2067_s13   ;;  %s1571_s12 = sphi %s1640_s12, %s2064_s12  }
   0xf   : > { %2027 = sst [smem:[#allocation16_spill]] %s1583_s15  ;;  %s1130_s22 = sadd.s32 4294967294, %s1603_s20  }
  0x10   : > { %2028 = sst [smem:[#allocation17_spill]] %s1591_s17  ;;  %p2004_p0 = scmp.eq.s32.totalorder %s1603_s20, 0 }
  0x11   : > { %2029 = sst [smem:[#allocation18_spill]] %s1595_s18  ;;  %p63_p1 = scmp.ne.s32.totalorder %s1587_s16, %s1583_s15 }
  0x12   : > { %p2006_p2 = scmp.eq.s32.totalorder %s1684_s21, 0  ;;  %p91_p3 = scmp.ne.s32.totalorder %s1579_s14, %s1575_s13 }
  0x13   : > { %p97_p4 = scmp.ne.s32.totalorder %s1575_s13, %s1571_s12  ;;  %p152_p9 = scmp.eq.s32.totalorder %s1130_s22, 3 }
  0x14   : > { %p1697_p6 = por %p2006_p2, %p63_p1  ;;  %p1703_p7 = por %p91_p3, %p2004_p0 }
  0x15   : > { %p1709_p8 = por %p97_p4, %p2006_p2  ;;  %p1133_p10 = scmp.ge.s32.totalorder %s1603_s20, 1 }
  0x16   : > { %s2030_s23 = scalar_select %p1697_p6, 1, 0 }
  0x17   : > { %s2032_s25 = scalar_select %p1709_p8, 1, 0 }
  0x18   : > { %p159_p11 = scmp.lt.s32.totalorder %s1603_s20, 5  ;;  %p1715_p12 = por %p152_p9, %p63_p1 }
  0x19   : > { %2033 = sst [smem:[#allocation19_spill]] %s2032_s25  ;;  %s1605_s28 = smov [#allocation9]  }
  0x1a   : > { %s2034_s26 = scalar_select %p1715_p12, 1, 0 }
  0x1b   : > { %p1719_p13 = pnand %p1133_p10, %p159_p11  ;;  %s171_s29 = sshll.u32 %s1605_s28, 4  ;;  %s172_s29 = int_to_ptr.vmem [resolvable:$true] %s171_s29 }
  0x1c   : > { %2035 = sst [smem:[#allocation20_spill]] %s2034_s26  ;;  %p1286_p1 = scmp.lt.s32.totalorder %s1603_s20, 4 }
  0x1d   : > { %s2036_s27 = scalar_select %p1719_p13, 1, 0 }
  0x1e   : > { %p1270_p3 = pneg %p1719_p13  ;;  %p1736_p9 = pnand %p1286_p1, %p1703_p7 }
  0x1f   : > { %s1420_s5 = scalar_lea.vmem %s172_s29, 256  ;;  %p1428_p12 = scmp.lt.s32.totalorder %s172_s29, %s172_s29 }
  0x20   : > { %p1727_p4 = pnand %p1270_p3, %p2006_p2  ;;  %p1421_p11 = scmp.ne.s32.totalorder %s172_s29, %s1420_s5 }
  0x21   : > { %p1429_p8 = scmp.lt.s32.totalorder %s1420_s5, %s1420_s5 }
  0x22   : > { %p1411_p10 = pneg %p1727_p4 }
  0x23   : > { %p1430_p3 = por %p1429_p8, %p1428_p12 }
  0x24   : > { %p1423_p5 = pnand %p1421_p11, %p1411_p10 }
  0x26   : > { %p1424_p0 = pneg %p1423_p5 }
  0x28   : > { %p1431_p2 = pnand %p1430_p3, %p1424_p0 }
  0x2a   : > { %1434 = shalt.err (!%p1431_p2)
}
  0x2b   : > { %s2007_s6 = smov 64   ;;  %s2009_s7 = smov 4  }
  0x2c   : > { %s2039_s2 = sld [smem:[#allocation24_spill]]  ;;  %s41_s10 = sadd.s32 1, %s1599_s19 }
  0x2d   : > { %p43_p0 = scmp.ge.s32.totalorder %s41_s10, 4  ;;  %s50_s11 = sadd.s32 1, %s1591_s17 }
  0x2e   : > { %p57_p2 = scmp.ne.s32.totalorder %s1591_s17, %s1587_s16  ;;  %s185_s12 = sand.u32 1, %s1591_s17  }
  0x2f   : > { %s2074_s10 = smov (%p43_p0, %s41_s10), 0  ;;  %p2040_p5 = scmp.eq.s32.totalorder %s1603_s20, 0 }
  0x30   : > { %p2041_p8 = scmp.eq.s32.totalorder %s1684_s21, 3  ;;  %s46_s24 = ssub.s32 %s1599_s19, %s2074_s10 }
  0x31   : > { %p59_p7 = por %p2040_p5, %p57_p2  ;;  %s1136_s28 = sshll.u32 %s185_s12, 3 }
  0x32   : > { %1273 = dma.hbm_to_vmem [thread:$0]  (!%p1727_p4), %s2039_s2, 256, %s172_s29, [#allocation8], %s2007_s6, %s2007_s6, %s2009_s7  }
  0x33   : > { %p1761_p12 = por %p2041_p8, %p57_p2  ;;  %p48_p4 = scmp.eq.s32.totalorder %s46_s24, 0 }
  0x34   : > { %s1137_s29 = sshll.u32 %s1599_s19, 6  ;;  %s2045_s0 = sld [smem:[#allocation23_spill]] }
  0x35   : > { %s2042_s22 = scalar_select %p1761_p12, 1, 0 }
  0x36   : > { %s1769_s30 = scalar_select %p48_p4, %s1591_s17, %s50_s11  }
  0x37   : > { %2043 = sst [smem:[#allocation21_spill]] %s2042_s22  ;;  %s189_s6 = scalar_lea.vmem [#allocation4], %s1136_s28 }
  0x38   : > { %2044 = sst [smem:[#allocation22_spill]] %s1769_s30  ;;  %s198_s7 = sshll.u32 %s189_s6, 4  ;;  %s199_s7 = int_to_ptr.vmem [resolvable:$true] %s198_s7 }
  0x39   : > { %p1776_p10 = pnand %p1286_p1, %p59_p7  ;;  %p73_p11 = scmp.lt.s32.totalorder %s1599_s19, 1 }
  0x3a   : > { %s197_s9 = scalar_lea.hbm %s2045_s0, %s1137_s29  ;;  %s1131_s26 = sadd.s32 4294967295, %s1599_s19 }
  0x3b   : > { %s186_s24 = scalar_lea.sflag [#allocation5], %s185_s12  ;;  %p1437_p3 = pneg %p1776_p10 }
  0x3c   : > { %s1448_s11 = scalar_lea.vmem %s199_s7, 128  ;;  %s1608_s5 = smov [#allocation4]  }
  0x3d   : > { %p1449_p0 = scmp.ne.s32.totalorder %s199_s7, %s1448_s11  ;;  %s1453_s29 = sshll.u32 %s1608_s5, 4  ;;  %s1454_s29 = int_to_ptr.vmem [resolvable:$false] %s1453_s29 }
  0x3e   : > { %s1455_s6 = scalar_lea.vmem %s1454_s29, 256  ;;  %p1456_p8 = scmp.lt.s32.totalorder %s199_s7, %s1454_s29 }
  0x3f   : > { %p1451_p2 = pnand %p1449_p0, %p1437_p3  ;;  %p1457_p4 = scmp.lt.s32.totalorder %s1455_s6, %s1448_s11 }
  0x41   : > { %p1452_p5 = pneg %p1451_p2  ;;  %p1458_p1 = por %p1457_p4, %p1456_p8 }
  0x43   : > { %p1459_p7 = pnand %p1458_p1, %p1452_p5 }
  0x45   : > { %1462 = shalt.err (!%p1459_p7)
}
  0x46   : > { %s1609_s28 = smov 256   ;;  %s2047_s8 = smov 4  }
  0x47   : > { %s2048_s12 = smov 64   ;;  %p76_p3 = scmp.lt.s32.totalorder %s2074_s10, 1 }
  0x48   : > { %1277 = dma.hbm_to_vmem [thread:$0]  (!%p1776_p10), %s197_s9, 128, %s199_s7, %s186_s24, %s1609_s28, %s2048_s12, %s2047_s8  }
  0x49   : > { %s75_s11 = scalar_select %p73_p11, %s1599_s19, %s1131_s26 }
  0x4a   : > { %s1132_s5 = sadd.s32 4294967295, %s2074_s10  ;;  %s84_s29 = sadd.s32 1, %s1579_s14 }
  0x4b   : > { %s208_s2 = sand.u32 1, %s1603_s20   ;;  %s210_s0 = sand.u32 1, %s1579_s14  }
  0x4c   : > { %s78_s6 = scalar_select %p76_p3, %s2074_s10, %s1132_s5 }
  0x4d   : > { %s1138_s17 = sshll.u32 %s210_s0, 3  ;;  %s1140_s15 = sshll.u32 %s75_s11, 6 }
  0x4e   : > { %s80_s30 = ssub.s32 %s75_s11, %s78_s6  ;;  %s212_s3 = scalar_lea.vmem [#allocation7], %s1138_s17 }
  0x4f   : > { %p82_p0 = scmp.eq.s32.totalorder %s80_s30, 0  ;;  %s224_s22 = sshll.u32 %s212_s3, 4  ;;  %s225_s22 = int_to_ptr.vmem [resolvable:$true] %s224_s22 }
  0x50   : > { %s223_s7 = scalar_lea.hbm %s2001_s1, %s1140_s15  ;;  %s209_s26 = scalar_lea.sflag [#allocation8], %s208_s2 }
  0x51   : > { %s1799_s18 = scalar_select %p82_p0, %s1579_s14, %s84_s29  }
  0x52   : > { %s1463_s9 = scalar_lea.hbm %s223_s7, 128  ;;  %p1465_p11 = pneg %p1736_p9 }
  0x53   : > { %p1464_p10 = scmp.ne.s32.totalorder %s223_s7, %s1463_s9  ;;  %p1469_p8 = scmp.lt.s32.totalorder %s223_s7, %s2001_s1 }
  0x55   : > { %p1466_p2 = pnand %p1465_p11, %p1464_p10 }
  0x57   : > { %p1467_p5 = pneg %p1466_p2 }
  0x59   : > { %p1472_p4 = pnand %p1469_p8, %p1467_p5 }
  0x5b   : > { %1475 = shalt.err (!%p1472_p4)
}
  0x5c   : > { %s1476_s3 = scalar_lea.vmem %s225_s22, 128  ;;  %s1610_s13 = smov [#allocation7]  }
  0x5d   : > { %p1477_p1 = scmp.ne.s32.totalorder %s225_s22, %s1476_s3  ;;  %s1481_s15 = sshll.u32 %s1610_s13, 4  ;;  %s1482_s15 = int_to_ptr.vmem [resolvable:$false] %s1481_s15 }
  0x5e   : > { %s1483_s17 = scalar_lea.vmem %s1482_s15, 256  ;;  %p1484_p0 = scmp.lt.s32.totalorder %s225_s22, %s1482_s15 }
  0x5f   : > { %p1479_p7 = pnand %p1477_p1, %p1465_p11  ;;  %p1485_p12 = scmp.lt.s32.totalorder %s1483_s17, %s1476_s3 }
  0x61   : > { %p1480_p3 = pneg %p1479_p7  ;;  %p1486_p6 = por %p1485_p12, %p1484_p0 }
  0x63   : > { %p1487_p13 = pnand %p1486_p6, %p1480_p3 }
  0x65   : > { %1490 = shalt.err (!%p1487_p13)
}
  0x66   : > { %1280 = dma.hbm_to_vmem [thread:$0]  (!%p1736_p9), %s223_s7, 128, %s225_s22, %s209_s26, %s1609_s28, %s2048_s12, %s2047_s8  }
  0x67   : > { %p2049_p10 = scmp.ne.s32.totalorder %s2036_s27, 0 }
  0x68   : > { %s1817_s25 = sand.u32 (!%p2049_p10), 1, %s1587_s16   ;;  %p2050_p6 = scmp.ne.s32.totalorder (!%p2049_p10), %s2030_s23, 0 }
  0x69   : > { %236 = sbr.rel (%p2049_p10) target bundleno = 1118 (0x45e), region = 32  ;;  %s1142_s30 = sshll.u32 (!%p2049_p10), %s1817_s25, 3 }
  0x6a   : > { %s239_s11 = scalar_lea.sflag (!%p2049_p10), [#allocation5], %s1817_s25  ;;  %s242_s5 = scalar_lea.vmem (!%p2049_p10), [#allocation4], %s1142_s30 }
  0x6e   : > { %1554 = dma.done.wait (%p2050_p6), %s239_s11, 128  }
  0x6f   : > { %1556 = vsyncadd (%p2050_p6), %s239_s11, 4294967168  ;;  %s2051_s4 = sld [smem:[#allocation15_spill]]  ;;  %s247_s28 = sand.u32 1, %s1684_s21  }
  0x70   : > { %s2052_s22 = sld [smem:[#allocation19_spill]]  ;;  %s248_s12 = scalar_lea.sflag [#allocation8], %s247_s28 }
  0x75   : > { %s249_s27 = sand.u32 1, %s2051_s4  }
  0x76   : > { %s1827_s8 = sshll.u32 %s249_s27, 3  ;;  %p2053_p13 = scmp.ne.s32.totalorder %s2052_s22, 0 }
  0x77   : > { %s251_s29 = scalar_lea.vmem [#allocation7], %s1827_s8 }
  0x78   : > { %1558 = dma.done.wait (%p2053_p13), %s248_s12, 128  }
  0x79   : > { %1560 = vsyncadd (%p2053_p13), %s248_s12, 4294967168  ;;  %p2054_p9 = scmp.eq.s32.totalorder %s1684_s21, 0 }
  0x7b   : > { %1562 = dma.done.wait (%p2054_p9), [#allocation8], 256   ;;  %p2055_p12 = pmov %p2054_p9 }
  0x7c   : > { %v1611_v0 = vmov 0.0   ;;  %vm1612_vm0 = vmmov 0   ;;  %v1373_v1 = vld [vmem:[#allocation9 + $0x8] sm:$0xff]   ;;  %s1613_s23 = smov 96   ;;  %v1374_v2 = vld [vmem:[#allocation9] sm:$0xff]   ;;  %vm320_vm1 = vcmask 261120  }
  0x7d   : > { %1564 = vsyncadd (%p2055_p12), [#allocation8], 4294967040  ;;  %1196 = vmatprep.subr.bf16.mxu0 %v1611_v0  ;;  %1204 = vmatprep.subr.bf16.mxu1 %v1611_v0  ;;  %v1375_v3 = vld [vmem:[%s242_s5] sm:$0xff]   ;;  %v1376_v6 = vld [vmem:[%s251_s29] sm:$0xff]   ;;  %vm429_vm2 = vcmask 60416   ;;  %s1614_s21 = smov 112  }
  0x7e   : > { %1200 = vmatprep.mubr.msk.bf16.mxu0 %vm1612_vm0, %v1611_v0  ;;  %1208 = vmatprep.mubr.msk.bf16.mxu1 %vm1612_vm0, %v1611_v0  ;;  %s1615_s2 = smov 120   ;;  %vm516_vm3 = vcmask 64512   ;;  %s1616_s6 = smov 104  }
  0x7f   : > { %372 = vrot.lane.b32.xlu0 %v1373_v1, %s1613_s23  ;;  %1197 = vmatpush3.bf16.msra.mxu0 %v1373_v1  ;;  %s1145_s7 = sshll.u32 %s1817_s25, 6  ;;  %s2056_s9 = sld [smem:[#allocation18_spill]] }
  0x80   : > { %1198 = vmatprep.subr.bf16.mxu0 %v1611_v0  ;;  %s1919_s26 = scalar_lea.vmem [#allocation10], %s1145_s7  ;;  %s2057_s24 = sld [smem:[#allocation21_spill]] }
  0x81   : > { %s1000_s3 = sshll.u32 %s1919_s26, 4  ;;  %s2058_s17 = sld [smem:[#allocation25_spill]]  ;;  %s1942_s3 = int_to_ptr.vmem [resolvable:$true] %s1000_s3 }
  0x82   : > { %s982_s5 = scalar_lea.sflag [#allocation6], %s1817_s25  ;;  %s1491_s4 = scalar_lea.vmem %s1942_s3, 1024 }
  0x83   : > { %370 = vrot.lane.b32.xlu0 %v1374_v2, %s1613_s23  ;;  %1199 = vmatpush3.bf16.msra.mxu0 %v1374_v2  ;;  %p1492_p11 = scmp.ne.s32.totalorder %s1942_s3, %s1491_s4  ;;  %s1617_s22 = smov [#allocation10]  }
  0x84   : > { %1212 = vmatprep.subr.bf16.mxu0 %v1611_v0  ;;  %s1495_s28 = sshll.u32 %s1617_s22, 4  ;;  %s1496_s28 = int_to_ptr.vmem [resolvable:$false] %s1495_s28 }
  0x85   : > { %s1173_s0 = sshll.u32 %s2056_s9, 10  ;;  %s1497_s27 = scalar_lea.vmem %s1496_s28, 2048 }
  0x86   : > { %1201 = vmatmul.mubr.msk.bf16.vlgmr.msra.gmra.mxu0 %vm320_vm1, %v1375_v3  ;;  %p2060_p2 = scmp.ne.s32.totalorder %s2057_s24, 0  ;;  %p1498_p4 = scmp.lt.s32.totalorder %s1942_s3, %s1496_s28 }
  0x87   : > { %1214 = vmatprep.mubr.msk.bf16.mxu0 %vm1612_vm0, %v1611_v0  ;;  %s2059_s30 = smov %s2058_s17  ;;  %s1940_s11 = scalar_lea.hbm %s2058_s17, %s1173_s0 }
  0x88   : > { %p1493_p5 = pnand %p1492_p11, %p2060_p2  ;;  %p1499_p1 = scmp.lt.s32.totalorder %s1497_s27, %s1491_s4 }
  0x8a   : > { %p1494_p8 = pneg %p1493_p5  ;;  %p1500_p7 = por %p1499_p1, %p1498_p4 }
  0x8c   : > { %p1501_p3 = pnand %p1500_p7, %p1494_p8 }
  0xf1   : > { %v373_v4 = vpop.permute.xlu0 %372 }
  0xf2   : > { %1205 = vmatpush3.bf16.msra.mxu1 %v373_v4 }
  0xf3   : > { %1206 = vmatprep.subr.bf16.mxu1 %v1611_v0 }
  0xf5   : > { %v371_v5 = vpop.permute.xlu0 %370 }
  0xf6   : > { %1207 = vmatpush3.bf16.msra.mxu1 %v371_v5 }
  0xf7   : > { %1218 = vmatprep.subr.bf16.mxu1 %v1611_v0 }
  0xf9   : > { %1209 = vmatmul.mubr.msk.bf16.vlgmr.msra.gmra.mxu1 %vm320_vm1, %v1376_v6 }
  0xfa   : > { %1220 = vmatprep.mubr.msk.bf16.mxu1 %vm1612_vm0, %v1611_v0 }
 0x146   : > { %v358_v7 = vpop.f32.mrf.mxu0 }
 0x147   : > { %v1169_v8 = vpack.c.bf16 %v358_v7, %v358_v7 }
 0x148   : > { %v1202_v9 = vpop.f32.mrf.mxu0 }
 0x149   : > { %430 = vst.msk [vmem:[#allocation2] sm:$0xf] %vm429_vm2, %v1169_v8 }
 0x14a   : > { %v361_v10 = vpop.f32.mrf.mxu0 }
 0x14b   : > { %v1170_v11 = vpack.c.bf16 %v361_v10, %v361_v10 }
 0x14c   : > { %v1203_v12 = vpop.f32.mrf.mxu0 }
 0x14d   : > { %431 = vst.msk [vmem:[#allocation2 + $0x10] sm:$0xf] %vm429_vm2, %v1170_v11 }
 0x150   : > { %v498_v21 = vld [vmem:[#allocation2] sm:$0xf] }
 0x154   : > { %v502_v48 = vld [vmem:[#allocation2 + $0x10] sm:$0xf] }
 0x1b9   : > { %v413_v13 = vpop.f32.mrf.mxu1 }
 0x1ba   : > { %v1171_v14 = vpack.c.bf16 %v413_v13, %v413_v13 }
 0x1bb   : > { %v1210_v15 = vpop.f32.mrf.mxu1 }
 0x1bc   : > { %439 = vst.msk [vmem:[#allocation3] sm:$0xf] %vm429_vm2, %v1171_v14  ;;  %468 = vrot.lane.b32.xlu0 %v1171_v14, %s1614_s21  ;;  %450 = vrot.lane.b32.xlu1 %v1171_v14, %s1615_s2 }
 0x1bd   : > { %v416_v16 = vpop.f32.mrf.mxu1 }
 0x1be   : > { %v1172_v17 = vpack.c.bf16 %v416_v16, %v416_v16 }
 0x1bf   : > { %v1211_v18 = vpop.f32.mrf.mxu1 }
 0x1c0   : > { %440 = vst.msk [vmem:[#allocation3 + $0x10] sm:$0xf] %vm429_vm2, %v1172_v17  ;;  %452 = vrot.lane.b32.xlu0 %v1172_v17, %s1615_s2  ;;  %441 = vrot.lane.b32.xlu1 %v1169_v8, %s1615_s2 }
 0x1c3   : > { %v508_v19 = vld [vmem:[#allocation3] sm:$0xf] }
 0x1c4   : > { %477 = vrot.lane.b32.xlu0 %v1169_v8, %s1616_s6  ;;  %486 = vrot.lane.b32.xlu1 %v1171_v14, %s1616_s6  ;;  %v521_v20 = vsel %vm516_vm3, %v508_v19, 0 }
 0x1c5   : > { %1213 = vmatpush3.bf16.xpose.msra.mxu0 %v521_v20 }
 0x1c6   : > { %1224 = vmatprep.subr.bf16.mxu0 %v1611_v0 }
 0x1c7   : > { %v512_v39 = vld [vmem:[#allocation3 + $0x10] sm:$0xf] }
 0x1c8   : > { %470 = vrot.lane.b32.xlu0 %v1172_v17, %s1614_s21  ;;  %459 = vrot.lane.b32.xlu1 %v1169_v8, %s1614_s21  ;;  %v705_v42 = vsel %vm516_vm3, %v512_v39, 0 }
 0x1cc   : > { %1215 = vmatmul.mubr.msk.bf16.vlgmr.msra.gmra.mxu0 %vm516_vm3, %v498_v21  ;;  %461 = vrot.lane.b32.xlu0 %v1170_v11, %s1614_s21 }
 0x1cd   : > { %443 = vrot.lane.b32.xlu1 %v1170_v11, %s1615_s2  ;;  %1226 = vmatprep.mubr.msk.bf16.mxu0 %vm1612_vm0, %v1611_v0 }
 0x1d1   : > { %488 = vrot.lane.b32.xlu1 %v1172_v17, %s1616_s6 }
 0x1d5   : > { %479 = vrot.lane.b32.xlu1 %v1170_v11, %s1616_s6 }
 0x22e   : > { %v469_v22 = vpop.permute.xlu0 %468  ;;  %v451_v23 = vpop.permute.xlu1 %450 }
 0x22f   : > { %475 = vst.msk [vmem:[#allocation3 + $0x8] sm:$0xf] %vm429_vm2, %v469_v22  ;;  %457 = vst.msk [vmem:[#allocation3 + $0x4] sm:$0xf] %vm429_vm2, %v451_v23 }
 0x232   : > { %v453_v24 = vpop.permute.xlu0 %452  ;;  %v442_v25 = vpop.permute.xlu1 %441 }
 0x233   : > { %458 = vst.msk [vmem:[#allocation3 + $0x14] sm:$0xf] %vm429_vm2, %v453_v24  ;;  %448 = vst.msk [vmem:[#allocation2 + $0x4] sm:$0xf] %vm429_vm2, %v442_v25 }
 0x236   : > { %v478_v26 = vpop.permute.xlu0 %477  ;;  %v487_v27 = vpop.permute.xlu1 %486  ;;  %v509_v28 = vld [vmem:[#allocation3 + $0x4] sm:$0xf]  ;;  %v510_v29 = vld [vmem:[#allocation3 + $0x8] sm:$0xf] }
 0x237   : > { %484 = vst.msk [vmem:[#allocation2 + $0xc] sm:$0xf] %vm429_vm2, %v478_v26  ;;  %493 = vst.msk [vmem:[#allocation3 + $0xc] sm:$0xf] %vm429_vm2, %v487_v27  ;;  %v567_v30 = vsel %vm516_vm3, %v509_v28, 0  ;;  %v613_v31 = vsel %vm516_vm3, %v510_v29, 0 }
 0x238   : > { %1219 = vmatpush3.bf16.xpose.msra.mxu1 %v567_v30  ;;  %1225 = vmatpush3.bf16.xpose.msra.mxu0 %v613_v31 }
 0x239   : > { %1230 = vmatprep.subr.bf16.mxu1 %v1611_v0  ;;  %1236 = vmatprep.subr.bf16.mxu0 %v1611_v0 }
 0x23a   : > { %v471_v32 = vpop.permute.xlu0 %470  ;;  %v460_v33 = vpop.permute.xlu1 %459  ;;  %v499_v35 = vld [vmem:[#allocation2 + $0x4] sm:$0xf]  ;;  %v513_v43 = vld [vmem:[#allocation3 + $0x14] sm:$0xf] }
 0x23b   : > { %476 = vst.msk [vmem:[#allocation3 + $0x18] sm:$0xf] %vm429_vm2, %v471_v32  ;;  %466 = vst.msk [vmem:[#allocation2 + $0x8] sm:$0xf] %vm429_vm2, %v460_v33  ;;  %v751_v46 = vsel %vm516_vm3, %v513_v43, 0 }
 0x23e   : > { %v462_v34 = vpop.permute.xlu0 %461  ;;  %v511_v36 = vld [vmem:[#allocation3 + $0xc] sm:$0xf] }
 0x23f   : > { %467 = vst.msk [vmem:[#allocation2 + $0x18] sm:$0xf] %vm429_vm2, %v462_v34  ;;  %v444_v37 = vpop.permute.xlu1 %443  ;;  %1221 = vmatmul.mubr.msk.bf16.vlgmr.msra.gmra.mxu1 %vm516_vm3, %v499_v35  ;;  %v659_v38 = vsel %vm516_vm3, %v511_v36, 0  ;;  %v501_v44 = vld [vmem:[#allocation2 + $0xc] sm:$0xf] }
 0x240   : > { %449 = vst.msk [vmem:[#allocation2 + $0x14] sm:$0xf] %vm429_vm2, %v444_v37  ;;  %1231 = vmatpush3.bf16.xpose.msra.mxu1 %v659_v38  ;;  %1232 = vmatprep.mubr.msk.bf16.mxu1 %vm1612_vm0, %v1611_v0 }
 0x241   : > { %1242 = vmatprep.subr.bf16.mxu1 %v1611_v0 }
 0x242   : > { %v500_v40 = vld [vmem:[#allocation2 + $0x8] sm:$0xf]  ;;  %v514_v47 = vld [vmem:[#allocation3 + $0x18] sm:$0xf] }
 0x243   : > { %v489_v41 = vpop.permute.xlu1 %488  ;;  %1227 = vmatmul.mubr.msk.bf16.vlgmr.msra.gmra.mxu0 %vm516_vm3, %v500_v40  ;;  %v797_v49 = vsel %vm516_vm3, %v514_v47, 0 }
 0x244   : > { %494 = vst.msk [vmem:[#allocation3 + $0x1c] sm:$0xf] %vm429_vm2, %v489_v41  ;;  %1237 = vmatpush3.bf16.xpose.msra.mxu0 %v705_v42  ;;  %1238 = vmatprep.mubr.msk.bf16.mxu0 %vm1612_vm0, %v1611_v0 }
 0x245   : > { %1248 = vmatprep.subr.bf16.mxu0 %v1611_v0 }
 0x246   : > { %v504_v53 = vld [vmem:[#allocation2 + $0x18] sm:$0xf] }
 0x247   : > { %v480_v45 = vpop.permute.xlu1 %479  ;;  %1233 = vmatmul.mubr.msk.bf16.vlgmr.msra.gmra.mxu1 %vm516_vm3, %v501_v44  ;;  %v503_v51 = vld [vmem:[#allocation2 + $0x14] sm:$0xf] }
 0x248   : > { %485 = vst.msk [vmem:[#allocation2 + $0x1c] sm:$0xf] %vm429_vm2, %v480_v45  ;;  %1243 = vmatpush3.bf16.xpose.msra.mxu1 %v751_v46  ;;  %1244 = vmatprep.mubr.msk.bf16.mxu1 %vm1612_vm0, %v1611_v0 }
 0x249   : > { %1254 = vmatprep.subr.bf16.mxu1 %v1611_v0 }
 0x24b   : > { %1239 = vmatmul.mubr.msk.bf16.vlgmr.msra.gmra.mxu0 %vm516_vm3, %v502_v48  ;;  %v515_v50 = vld [vmem:[#allocation3 + $0x1c] sm:$0xf] }
 0x24c   : > { %1249 = vmatpush3.bf16.xpose.msra.mxu0 %v797_v49  ;;  %1250 = vmatprep.mubr.msk.bf16.mxu0 %vm1612_vm0, %v1611_v0  ;;  %v843_v52 = vsel %vm516_vm3, %v515_v50, 0 }
 0x24f   : > { %1245 = vmatmul.mubr.msk.bf16.vlgmr.msra.gmra.mxu1 %vm516_vm3, %v503_v51  ;;  %v505_v54 = vld [vmem:[#allocation2 + $0x1c] sm:$0xf] }
 0x250   : > { %1255 = vmatpush3.bf16.xpose.msra.mxu1 %v843_v52  ;;  %1256 = vmatprep.mubr.msk.bf16.mxu1 %vm1612_vm0, %v1611_v0 }
 0x253   : > { %1251 = vmatmul.mubr.msk.bf16.vlgmr.msra.gmra.mxu0 %vm516_vm3, %v504_v53 }
 0x257   : > { %1257 = vmatmul.mubr.msk.bf16.vlgmr.msra.gmra.mxu1 %vm516_vm3, %v505_v54 }
 0x28c   : > { %v557_v55 = vpop.f32.mrf.mxu0 }
 0x28d   : > { %v885_v56 = vsel %vm516_vm3, %v557_v55, -inf }
 0x28e   : > { %886 = vmax.xlane.f32.xlu0 %v885_v56  ;;  %v1216_v57 = vpop.f32.mrf.mxu0 }
 0x290   : > { %v560_v58 = vpop.f32.mrf.mxu0 }
 0x292   : > { %v1217_v59 = vpop.f32.mrf.mxu0 }
 0x2ff   : > { %v603_v60 = vpop.f32.mrf.mxu1 }
 0x300   : > { %v888_v61 = vsel %vm516_vm3, %v603_v60, -inf }
 0x301   : > { %v1222_v62 = vpop.f32.mrf.mxu1  ;;  %889 = vmax.xlane.f32.xlu1 %v888_v61 }
 0x303   : > { %v606_v63 = vpop.f32.mrf.mxu1  ;;  %v649_v0 = vpop.f32.mrf.mxu0 }
 0x304   : > { %v891_v1 = vsel %vm516_vm3, %v649_v0, -inf }
 0x305   : > { %v1223_v2 = vpop.f32.mrf.mxu1  ;;  %892 = vmax.xlane.f32.xlu0 %v891_v1  ;;  %v1228_v3 = vpop.f32.mrf.mxu0 }
 0x307   : > { %v652_v4 = vpop.f32.mrf.mxu0  ;;  %v695_v5 = vpop.f32.mrf.mxu1 }
 0x308   : > { %v894_v6 = vsel %vm516_vm3, %v695_v5, -inf }
 0x309   : > { %v1234_v7 = vpop.f32.mrf.mxu1  ;;  %895 = vmax.xlane.f32.xlu0 %v894_v6  ;;  %v1229_v8 = vpop.f32.mrf.mxu0 }
 0x30b   : > { %v698_v9 = vpop.f32.mrf.mxu1  ;;  %v741_v10 = vpop.f32.mrf.mxu0 }
 0x30c   : > { %v897_v11 = vsel %vm516_vm3, %v741_v10, -inf }
 0x30d   : > { %v1235_v12 = vpop.f32.mrf.mxu1  ;;  %898 = vmax.xlane.f32.xlu1 %v897_v11  ;;  %v1240_v13 = vpop.f32.mrf.mxu0 }
 0x30f   : > { %v744_v14 = vpop.f32.mrf.mxu0  ;;  %v787_v15 = vpop.f32.mrf.mxu1 }
 0x310   : > { %v900_v16 = vsel %vm516_vm3, %v787_v15, -inf }
 0x311   : > { %v1246_v17 = vpop.f32.mrf.mxu1  ;;  %901 = vmax.xlane.f32.xlu0 %v900_v16  ;;  %v1241_v18 = vpop.f32.mrf.mxu0 }
 0x313   : > { %v790_v19 = vpop.f32.mrf.mxu1  ;;  %v833_v20 = vpop.f32.mrf.mxu0 }
 0x314   : > { %v903_v21 = vsel %vm516_vm3, %v833_v20, -inf }
 0x315   : > { %v1247_v22 = vpop.f32.mrf.mxu1  ;;  %904 = vmax.xlane.f32.xlu1 %v903_v21  ;;  %v1252_v23 = vpop.f32.mrf.mxu0 }
 0x317   : > { %v879_v24 = vpop.f32.mrf.mxu1  ;;  %v887_v25 = vpop.xlane.xlu0 %886 }
 0x318   : > { %v909_v26 = vsub.f32 %v557_v55, %v887_v25  ;;  %v836_v27 = vpop.f32.mrf.mxu0  ;;  %v906_v28 = vsel %vm516_vm3, %v879_v24, -inf }
 0x319   : > { %v1258_v29 = vpop.f32.mrf.mxu1  ;;  %907 = vmax.xlane.f32.xlu0 %v906_v28 }
 0x31a   : > { %v917_v30 = vmul.f32 1.442695, %v909_v26  ;;  %v1253_v31 = vpop.f32.mrf.mxu0 }
 0x31b   : > { %v882_v32 = vpop.f32.mrf.mxu1 }
 0x31c   : > { %1377 = vpow2.f32 %v917_v30 }
 0x31d   : > { %v1259_v33 = vpop.f32.mrf.mxu1 }
 0x329   : > { %v1378_v34 = vpop.eup %1377 }
 0x32a   : > { %v933_v35 = vsel %vm516_vm3, %v1378_v34, 0.0 }
 0x32b   : > { %934 = vadd.xlane.f32.xlu1 %v933_v35 }
 0x38a   : > { %v890_v36 = vpop.xlane.xlu1 %889 }
 0x38b   : > { %v910_v37 = vsub.f32 %v603_v60, %v890_v36 }
 0x38d   : > { %v919_v38 = vmul.f32 1.442695, %v910_v37 }
 0x38e   : > { %v893_v39 = vpop.xlane.xlu0 %892 }
 0x38f   : > { %1379 = vpow2.f32 %v919_v38  ;;  %v911_v40 = vsub.f32 %v649_v0, %v893_v39 }
 0x391   : > { %v921_v41 = vmul.f32 1.442695, %v911_v40 }
 0x392   : > { %v896_v42 = vpop.xlane.xlu0 %895 }
 0x393   : > { %1381 = vpow2.f32 %v921_v41  ;;  %v912_v43 = vsub.f32 %v695_v5, %v896_v42 }
 0x395   : > { %v923_v44 = vmul.f32 1.442695, %v912_v43 }
 0x396   : > { %v899_v45 = vpop.xlane.xlu1 %898 }
 0x397   : > { %1383 = vpow2.f32 %v923_v44  ;;  %v913_v46 = vsub.f32 %v741_v10, %v899_v45 }
 0x399   : > { %v925_v47 = vmul.f32 1.442695, %v913_v46 }
 0x39a   : > { %v902_v48 = vpop.xlane.xlu0 %901 }
 0x39b   : > { %1385 = vpow2.f32 %v925_v47  ;;  %v914_v49 = vsub.f32 %v787_v15, %v902_v48 }
 0x39c   : > { %v1380_v50 = vpop.eup %1379 }
 0x39d   : > { %v927_v51 = vmul.f32 1.442695, %v914_v49  ;;  %v936_v52 = vsel %vm516_vm3, %v1380_v50, 0.0 }
 0x39e   : > { %937 = vadd.xlane.f32.xlu0 %v936_v52  ;;  %v905_v53 = vpop.xlane.xlu1 %904 }
 0x39f   : > { %1387 = vpow2.f32 %v927_v51  ;;  %v915_v54 = vsub.f32 %v833_v20, %v905_v53 }
 0x3a0   : > { %v1382_v55 = vpop.eup %1381 }
 0x3a1   : > { %v929_v56 = vmul.f32 1.442695, %v915_v54  ;;  %v939_v57 = vsel %vm516_vm3, %v1382_v55, 0.0 }
 0x3a2   : > { %v908_v58 = vpop.xlane.xlu0 %907  ;;  %940 = vadd.xlane.f32.xlu1 %v939_v57 }
 0x3a3   : > { %1389 = vpow2.f32 %v929_v56  ;;  %v916_v59 = vsub.f32 %v879_v24, %v908_v58 }
 0x3a4   : > { %v1384_v60 = vpop.eup %1383 }
 0x3a5   : > { %v931_v61 = vmul.f32 1.442695, %v916_v59  ;;  %v942_v62 = vsel %vm516_vm3, %v1384_v60, 0.0 }
 0x3a6   : > { %943 = vadd.xlane.f32.xlu0 %v942_v62 }
 0x3a7   : > { %1391 = vpow2.f32 %v931_v61 }
 0x3a8   : > { %v1386_v63 = vpop.eup %1385 }
 0x3a9   : > { %v945_v0 = vsel %vm516_vm3, %v1386_v63, 0.0 }
 0x3aa   : > { %946 = vadd.xlane.f32.xlu1 %v945_v0 }
 0x3ac   : > { %v1388_v1 = vpop.eup %1387 }
 0x3ad   : > { %v948_v2 = vsel %vm516_vm3, %v1388_v1, 0.0 }
 0x3ae   : > { %949 = vadd.xlane.f32.xlu0 %v948_v2 }
 0x3b0   : > { %v1390_v3 = vpop.eup %1389 }
 0x3b1   : > { %v951_v4 = vsel %vm516_vm3, %v1390_v3, 0.0 }
 0x3b2   : > { %952 = vadd.xlane.f32.xlu1 %v951_v4 }
 0x3b4   : > { %v1392_v5 = vpop.eup %1391  ;;  %v935_v6 = vpop.xlane.xlu1 %934 }
 0x3b5   : > { %1393 = vrcp.f32 %v935_v6  ;;  %v954_v7 = vsel %vm516_vm3, %v1392_v5, 0.0 }
 0x3b6   : > { %955 = vadd.xlane.f32.xlu0 %v954_v7 }
 0x3c2   : > { %v1394_v8 = vpop.eup %1393 }
 0x3c3   : > { %v965_v9 = vmul.f32 %v1394_v8, %v1378_v34 }
 0x3c5   : > { %973 = vst.msk [vmem:[%s1919_s26] sm:$0xff] %vm516_vm3, %v965_v9 }
 0x427   : > { %v938_v10 = vpop.xlane.xlu0 %937 }
 0x428   : > { %1395 = vrcp.f32 %v938_v10 }
 0x42b   : > { %v941_v11 = vpop.xlane.xlu1 %940 }
 0x42c   : > { %1397 = vrcp.f32 %v941_v11 }
 0x42f   : > { %v944_v12 = vpop.xlane.xlu0 %943 }
 0x430   : > { %1399 = vrcp.f32 %v944_v12 }
 0x433   : > { %v947_v13 = vpop.xlane.xlu1 %946 }
 0x434   : > { %1401 = vrcp.f32 %v947_v13 }
 0x435   : > { %v1396_v14 = vpop.eup %1395 }
 0x436   : > { %v966_v15 = vmul.f32 %v1396_v14, %v1380_v50 }
 0x437   : > { %v950_v16 = vpop.xlane.xlu0 %949 }
 0x438   : > { %974 = vst.msk [vmem:[%s1919_s26 + $0x8] sm:$0xff] %vm516_vm3, %v966_v15  ;;  %1403 = vrcp.f32 %v950_v16 }
 0x439   : > { %v1398_v17 = vpop.eup %1397 }
 0x43a   : > { %v967_v18 = vmul.f32 %v1398_v17, %v1382_v55 }
 0x43b   : > { %v953_v19 = vpop.xlane.xlu1 %952 }
 0x43c   : > { %975 = vst.msk [vmem:[%s1919_s26 + $0x10] sm:$0xff] %vm516_vm3, %v967_v18  ;;  %1405 = vrcp.f32 %v953_v19 }
 0x43d   : > { %v1400_v20 = vpop.eup %1399 }
 0x43e   : > { %v968_v21 = vmul.f32 %v1400_v20, %v1384_v60 }
 0x43f   : > { %v956_v22 = vpop.xlane.xlu0 %955 }
 0x440   : > { %976 = vst.msk [vmem:[%s1919_s26 + $0x18] sm:$0xff] %vm516_vm3, %v968_v21  ;;  %1407 = vrcp.f32 %v956_v22 }
 0x441   : > { %v1402_v23 = vpop.eup %1401 }
 0x442   : > { %v969_v24 = vmul.f32 %v1402_v23, %v1386_v63 }
 0x444   : > { %977 = vst.msk [vmem:[%s1919_s26 + $0x20] sm:$0xff] %vm516_vm3, %v969_v24 }
 0x445   : > { %v1404_v25 = vpop.eup %1403 }
 0x446   : > { %v970_v26 = vmul.f32 %v1404_v25, %v1388_v1 }
 0x448   : > { %978 = vst.msk [vmem:[%s1919_s26 + $0x28] sm:$0xff] %vm516_vm3, %v970_v26 }
 0x449   : > { %v1406_v27 = vpop.eup %1405 }
 0x44a   : > { %v971_v28 = vmul.f32 %v1406_v27, %v1390_v3 }
 0x44c   : > { %979 = vst.msk [vmem:[%s1919_s26 + $0x30] sm:$0xff] %vm516_vm3, %v971_v28 }
 0x44d   : > { %v1408_v29 = vpop.eup %1407 }
 0x44e   : > { %v972_v30 = vmul.f32 %v1408_v29, %v1392_v5 }
 0x450   : > { %980 = vst.msk [vmem:[%s1919_s26 + $0x38] sm:$0xff] %vm516_vm3, %v972_v30 }
 0x451   : > { %1504 = shalt.err (!%p1501_p3)
}
 0x452   : > { %s1505_s8 = scalar_lea.hbm %s1940_s11, 1024  ;;  %s1509_s23 = scalar_lea.hbm %s2059_s30, 4096 }
 0x453   : > { %p1506_p0 = scmp.ne.s32.totalorder %s1940_s11, %s1505_s8  ;;  %p1510_p13 = scmp.lt.s32.totalorder %s1940_s11, %s2059_s30 }
 0x454   : > { %p1511_p9 = scmp.lt.s32.totalorder %s1509_s23, %s1505_s8 }
 0x455   : > { %p1507_p10 = pnand %p1506_p0, %p2060_p2 }
 0x456   : > { %p1512_p12 = por %p1511_p9, %p1510_p13 }
 0x457   : > { %p1508_p6 = pneg %p1507_p10 }
 0x459   : > { %p1513_p11 = pnand %p1512_p12, %p1508_p6 }
 0x45b   : > { %1516 = shalt.err (!%p1513_p11)
}
 0x45c   : > { %s1618_s6 = smov 128   ;;  %s1619_s7 = smov 8  }
 0x45d   : > { %1268 = dma.vmem_to_hbm [thread:$0]  (%p2060_p2), %s1942_s3, 1024, %s1940_s11, %s982_s5, %s1618_s6, %s1618_s6, %s1619_s7  }
 0x45e PF: > { %s2061_s26 = sld [smem:[#allocation16_spill]]  ;;  %p1288_p5 = scmp.ge.s32.totalorder %s1603_s20, 2 }
 0x45f   : > { %s2062_s9 = sld [smem:[#allocation20_spill]] }
 0x464   : > { %s1015_s0 = sand.u32 1, %s2061_s26  }
 0x465   : > { %p2063_p8 = scmp.ne.s32.totalorder %s2062_s9, 0  ;;  %s1016_s13 = scalar_lea.sflag [#allocation6], %s1015_s0 }
 0x467   : > { %p1282_p4 = pnand %p1288_p5, %p2063_p8 }
 0x469   : > { %p1283_p1 = pneg %p1282_p4 }
 0x46b   : > { %1566 = dma.done.wait (%p1283_p1), %s1016_s13, 1024  }
 0x46c   : > { %1568 = vsyncadd (%p1283_p1), %s1016_s13, 4294966272  ;;  %s22_s20 = sadd.s32 1, %s1603_s20   ;;  %s2064_s12 = sld [smem:[#allocation15_spill]] }
 0x46d   : > { %p19_p7 = scmp.ge.s32.totalorder %s22_s20, 6   ;;  %s2065_s25 = sld [smem:[#allocation17_spill]] }
 0x46e   : > { %s2066_s17 = sld [smem:[#allocation22_spill]]  ;;  %s2067_s13 = smov %s1579_s14 }
 0x46f   : > { %s2068_s14 = smov %s1799_s18  ;;  %s2069_s15 = smov %s1587_s16 }
 0x470   : > { %s2071_s18 = smov %s1599_s19  ;;  %s2072_s19 = smov %s2074_s10 }
 0x471   :  { %21 = sbr.rel (!%p19_p7) target bundleno = 14 (0xe), region = 106 }
 0x473   : > { %s2070_s16 = smov %s2065_s25 }
 0x476   :  { %1021 = vsyncpa [#allocation5], 1 }
 0x477   :  { %1023 = vsyncpa [#allocation5 + $0x1], 1 }
 0x478   :  { %1024 = vsyncpa [#allocation8], 1 }
 0x479   :  { %1026 = vsyncpa [#allocation8 + $0x1], 1 }
 0x47a   :  { %1027 = vsyncpa [#allocation6], 1 }
 0x47b   :  { %1029 = vsyncpa [#allocation6 + $0x1], 1 }

</bundles_post_ra>
